<compile_context>
chip_gen: v7x
topology: tpu7x:2x2x1
jax: 0.10.0
libtpu: 0.0.40
codegen_flags: <defaults>
</compile_context>

<pallas_src>
import math

import jax
import jax.numpy as jnp
from jax.experimental import pallas as pl
from jax.experimental.pallas import tpu as pltpu

LANE = 128


def _round_up(x, m):
    return ((x + m - 1) // m) * m


def _gelu(x):
    # TODO(synk): torch.nn.GELU() defaults to the exact erf-based GELU; Mosaic
    # lowering of lax.erf is not guaranteed, so we use the tanh approximation
    # (max abs deviation ~1e-3 vs the erf form). tanh lands in the EUP slot,
    # which is free next to the MXU work.
    c = math.sqrt(2.0 / math.pi)
    return 0.5 * x * (1.0 + jnp.tanh(c * (x + 0.044715 * x * x * x)))


def _fused_mlp_kernel(x_ref, w1_ref, w2_ref, w3_ref, b_ref, out_ref):
    """All Q per-key 3-layer MLPs fused into one block-diagonal bf16 pass.

    x_ref  : (TM, img_dim + Q*emb_dim) f32   shared img rows + lane-packed embeddings
    w1_ref : (img_dim + Q*emb_dim, QD) bf16  layer-1 (dense img rows + block-diag emb rows)
    w2_ref : (QD, QD)                  bf16  layer-2, block diagonal
    w3_ref : (QD, NP)                  bf16  layer-3: Q per-key columns, column Q = their
                                             row-sum (fused final_output), zero-padded to NP
    b_ref  : (3, BP)                   f32   packed biases [b1; b2; b3 + sum lane], zero-padded
    out_ref: (TM, NP)                  f32   lane-dense: lanes 0..Q-1 per-key maps, lane Q = sum
    """
    qd = w2_ref.shape[0]
    np_lanes = out_ref.shape[1]

    x = x_ref[...].astype(jnp.bfloat16)
    h = jnp.dot(x, w1_ref[...], preferred_element_type=jnp.float32)
    h = _gelu(h + b_ref[0:1, 0:qd])
    h = jnp.dot(h.astype(jnp.bfloat16), w2_ref[...], preferred_element_type=jnp.float32)
    h = _gelu(h + b_ref[1:2, 0:qd])
    y = jnp.dot(h.astype(jnp.bfloat16), w3_ref[...], preferred_element_type=jnp.float32)
    y = y + b_ref[2:3, 0:np_lanes]
    out_ref[...] = y.astype(out_ref.dtype)


def _block_diag(mats):
    """Block-diagonal stack of equally-shaped (r, c) matrices -> (Q*r, Q*c)."""
    q = len(mats)
    r, c = mats[0].shape
    out = jnp.zeros((q * r, q * c), mats[0].dtype)
    for k, m in enumerate(mats):
        out = out.at[k * r:(k + 1) * r, k * c:(k + 1) * c].set(m)
    return out


def _choose_tm(m):
    """Row-tile size: full slab for small M (single grid step); otherwise aim
    for >=2 steps (so v7x megacore can shard rows across both TensorCores),
    capped at 512 rows so double-buffered activation/output tiles stay small
    relative to v7x's 64 MiB VMEM. pl.cdiv handles ragged last blocks."""
    if m <= 128:
        return m                                  # full dim: always a legal block
    return min(512, _round_up(pl.cdiv(m, 2), 8))


def init_params(key, input_dim, query_list):
    """Deterministic parameter init mimicking torch.nn.Linear defaults.

    Weights stored as (in, out) so the model computes x @ W + b.
    """
    params = {}
    for q in sorted(query_list):
        key, *ks = jax.random.split(key, 7)
        k1 = 1.0 / math.sqrt(input_dim)
        params[q] = {
            "w1": jax.random.uniform(ks[0], (input_dim, input_dim), jnp.float32, -k1, k1),
            "b1": jax.random.uniform(ks[1], (input_dim,), jnp.float32, -k1, k1),
            "w2": jax.random.uniform(ks[2], (input_dim, input_dim), jnp.float32, -k1, k1),
            "b2": jax.random.uniform(ks[3], (input_dim,), jnp.float32, -k1, k1),
            "w3": jax.random.uniform(ks[4], (input_dim, 1), jnp.float32, -k1, k1),
            "b3": jax.random.uniform(ks[5], (1,), jnp.float32, -k1, k1),
        }
    return params


def pack_params(params, query_list, img_query_dim, query_emb_dim):
    """One-time weight fusion (hoisted out of the per-call hot path).

    Produces bf16 fused weights + an f32 packed-bias block for the kernel.
    """
    keys = sorted(query_list)
    Q = len(keys)
    D = img_query_dim + query_emb_dim
    QD = Q * D
    NP = _round_up(Q + 1, LANE)            # lane-dense output width (Q key lanes + sum lane)
    BP = _round_up(max(QD, NP), LANE)      # common padded bias width
    f32, bf16 = jnp.float32, jnp.bfloat16

    # Layer 1: img rows shared across keys (dense), emb rows block-diagonal.
    w1_img = jnp.concatenate([params[k]["w1"][:img_query_dim] for k in keys], axis=1)
    w1_emb = _block_diag([params[k]["w1"][img_query_dim:] for k in keys])
    w1 = jnp.concatenate([w1_img, w1_emb], axis=0)            # (img_dim + Q*emb_dim, QD)

    # Layer 2: block diagonal.
    w2 = _block_diag([params[k]["w2"] for k in keys])          # (QD, QD)

    # Layer 3: Q per-key columns + one fused sum column, zero-padded to NP lanes.
    w3_blocks = _block_diag([params[k]["w3"] for k in keys])   # (QD, Q)
    w3_sum = jnp.concatenate([params[k]["w3"] for k in keys], axis=0)  # (QD, 1)
    w3 = (jnp.zeros((QD, NP), f32)
          .at[:, :Q].set(w3_blocks)
          .at[:, Q:Q + 1].set(w3_sum))

    b1 = jnp.concatenate([params[k]["b1"] for k in keys])      # (QD,)
    b2 = jnp.concatenate([params[k]["b2"] for k in keys])      # (QD,)
    b3 = jnp.concatenate([params[k]["b3"] for k in keys])      # (Q,)
    b3 = jnp.concatenate([b3, jnp.sum(b3, keepdims=True)])     # (Q+1,), last = fused sum bias
    bpack = (jnp.zeros((3, BP), f32)
             .at[0, :QD].set(b1)
             .at[1, :QD].set(b2)
             .at[2, :Q + 1].set(b3))

    return {
        "keys": tuple(keys),
        "img_dim": img_query_dim,
        "emb_dim": query_emb_dim,
        "Q": Q, "D": D, "QD": QD, "NP": NP,
        "w1": w1.astype(bf16),
        "w2": w2.astype(bf16),
        "w3": w3.astype(bf16),
        "b": bpack,
    }


def feature_iabc_sep_forward(extractor_dict, pos_emb, query_emb, N, packed):
    """JAX/Pallas equivalent of feature_IABC_sep.forward (weights from pack_params)."""
    del pos_emb, N  # unused by the PyTorch forward as well

    img_query = extractor_dict["img_query"]            # (B, Nq, img_query_dim)
    B, Nq, img_dim = img_query.shape
    keys = packed["keys"]
    Q, QD, NP = packed["Q"], packed["QD"], packed["NP"]
    emb_dim = packed["emb_dim"]
    M = B * Nq
    in1 = img_dim + Q * emb_dim
    f32 = jnp.float32

    # Activations: shared img rows once + lane-packed per-key embeddings -> one stream.
    x = jnp.concatenate(
        [img_query.reshape(M, img_dim)]
        + [query_emb[k].reshape(M, emb_dim) for k in keys], axis=1).astype(f32)  # (M, in1)

    TM = _choose_tm(M)
    grid = (pl.cdiv(M, TM),)

    flops = 2 * M * (in1 * QD + QD * QD + QD * NP) + 4 * M * QD
    bytes_accessed = (4 * x.size
                      + 2 * (packed["w1"].size + packed["w2"].size + packed["w3"].size)
                      + 4 * packed["b"].size + 4 * M * NP)
    cost = pl.CostEstimate(flops=flops, transcendentals=2 * M * QD,
                           bytes_accessed=bytes_accessed)

    # TODO(synk): for large Q*D configs on v7x (64 MiB VMEM), set
    # pipeline_mode=pl.Buffered(1) on the constant-index weight specs so the
    # resident (Q*D)^2 weights are not double-buffered.
    grid_spec = pltpu.PrefetchScalarGridSpec(
        num_scalar_prefetch=0,
        grid=grid,
        in_specs=[
            pl.BlockSpec((TM, in1), lambda m: (m, 0)),            # activations (tiled on M)
            pl.BlockSpec(packed["w1"].shape, lambda m: (0, 0)),   # fused layer-1 (bf16)
            pl.BlockSpec(packed["w2"].shape, lambda m: (0, 0)),   # block-diag layer-2 (bf16)
            pl.BlockSpec(packed["w3"].shape, lambda m: (0, 0)),   # layer-3 + sum column (bf16)
            pl.BlockSpec(packed["b"].shape, lambda m: (0, 0)),    # packed biases (f32)
        ],
        out_specs=pl.BlockSpec((TM, NP), lambda m: (m, 0)),       # lane-dense output
    )

    out = pl.pallas_call(
        _fused_mlp_kernel,
        grid_spec=grid_spec,
        out_shape=jax.ShapeDtypeStruct((M, NP), f32),
        compiler_params=pltpu.CompilerParams(
            dimension_semantics=("parallel",)),   # row tiles are independent
        cost_estimate=cost,
    )(x, packed["w1"], packed["w2"], packed["w3"], packed["b"])

    # Lane Q holds the fused per-key sum; lanes 0..Q-1 are the per-key maps.
    final_output = out[:, Q].reshape(B, Nq)
    output_dict = {f"sep_map_{k}": out[:, i].reshape(B, Nq)
                   for i, k in enumerate(keys)}
    return final_output, output_dict


def _reference_forward(extractor_dict, query_emb, params):
    """Pure-JAX f32 reference (same math, per-key loop) for a correctness check."""
    img_query = extractor_dict["img_query"]
    keys = sorted(list(query_emb.keys()))
    final = None
    outs = {}
    for k in keys:
        x = jnp.concatenate([img_query, query_emb[k]], axis=2)
        p = params[k]
        h = _gelu(x @ p["w1"] + p["b1"])
        h = _gelu(h @ p["w2"] + p["b2"])
        y = (h @ p["w3"] + p["b3"])              # (B, N, 1)
        y = y.reshape(y.shape[0], -1)            # (B, N)
        final = y if final is None else final + y
        outs[f"sep_map_{k}"] = y
    return final, outs


if __name__ == "__main__":
    B, Nq = 2, 8
    img_query_dim, query_emb_dim = 24, 8
    query_list = ["color", "material", "shape"]

    root = jax.random.PRNGKey(0)
    k_img, k_pos, k_emb, k_par = jax.random.split(root, 4)

    extractor_dict = {
        "img_query": jax.random.normal(k_img, (B, Nq, img_query_dim), jnp.float32)
    }
    pos_emb = jax.random.normal(k_pos, (B, Nq, 2), jnp.float32)  # unused (as in torch)
    emb_keys = jax.random.split(k_emb, len(query_list))
    query_emb = {
        q: jax.random.normal(emb_keys[i], (B, Nq, query_emb_dim), jnp.float32)
        for i, q in enumerate(query_list)
    }

    params = init_params(k_par, img_query_dim + query_emb_dim, query_list)

    # One-time weight fusion (hoisted out of the per-call hot path).
    packed = pack_params(params, query_list, img_query_dim, query_emb_dim)
    jax.block_until_ready((packed["w1"], packed["w2"], packed["w3"], packed["b"]))

    final_output, output_dict = feature_iabc_sep_forward(
        extractor_dict, pos_emb, query_emb, Nq, packed)
    jax.block_until_ready(final_output)
    jax.block_until_ready(output_dict)

    # Sanity check against the pure-JAX f32 reference (kernel uses bf16 MXU dots,
    # so tolerances are loosened accordingly).
    ref_final, ref_dict = _reference_forward(extractor_dict, query_emb, params)
    assert final_output.shape == (B, Nq)
    assert jnp.allclose(final_output, ref_final, atol=5e-2, rtol=5e-2)
    for k in ref_dict:
        assert output_dict[k].shape == (B, Nq)
        assert jnp.allclose(output_dict[k], ref_dict[k], atol=5e-2, rtol=5e-2)

    print("KERNEL_OK")
</pallas_src>

<mosaic_0001>
module attributes {stable_mosaic.version = 11 : i64} {
  func.func @_fused_mlp_kernel(%arg0: i32, %arg1: memref<16x48xf32, #tpu.memory_space<vmem>>, %arg2: memref<48x96xbf16, #tpu.memory_space<vmem>>, %arg3: memref<96x96xbf16, #tpu.memory_space<vmem>>, %arg4: memref<96x128xbf16, #tpu.memory_space<vmem>>, %arg5: memref<3x128xf32, #tpu.memory_space<vmem>>, %arg6: memref<16x128xf32, #tpu.memory_space<vmem>>) attributes {dimension_semantics = [#tpu.dimension_semantics<parallel>], iteration_bounds = array<i64: 1>, scalar_prefetch = 0 : i64, scratch_operands = 0 : i64, tpu.core_type = #tpu.core_type<tc>, window_params = [{transform_indices = @transform_0, window_bounds = array<i64: 16, 48>}, {pipeline_mode = #tpu.pipeline_mode<synchronous>, transform_indices = @transform_1, window_bounds = array<i64: 48, 96>}, {pipeline_mode = #tpu.pipeline_mode<synchronous>, transform_indices = @transform_2, window_bounds = array<i64: 96, 96>}, {pipeline_mode = #tpu.pipeline_mode<synchronous>, transform_indices = @transform_3, window_bounds = array<i64: 96, 128>}, {pipeline_mode = #tpu.pipeline_mode<synchronous>, transform_indices = @transform_4, window_bounds = array<i64: 3, 128>}, {transform_indices = @transform_5, window_bounds = array<i64: 16, 128>}]} {
    %c0 = arith.constant 0 : index
    %c0_0 = arith.constant 0 : index
    %0 = vector.load %arg1[%c0, %c0_0] : memref<16x48xf32, #tpu.memory_space<vmem>>, vector<16x48xf32>
    %1 = arith.truncf %0 : vector<16x48xf32> to vector<16x48xbf16>
    %c0_1 = arith.constant 0 : index
    %c0_2 = arith.constant 0 : index
    %2 = vector.load %arg2[%c0_1, %c0_2] : memref<48x96xbf16, #tpu.memory_space<vmem>>, vector<48x96xbf16>
    %cst = arith.constant dense<0.000000e+00> : vector<16x96xf32>
    %3 = tpu.matmul %1, %2, %cst {dimension_numbers = #tpu.dot_dimension_numbers<[1], [0], [0], [1], [0, 0, 1, 1], [], []>} : vector<16x48xbf16>, vector<48x96xbf16>, vector<16x96xf32> -> vector<16x96xf32>
    %c0_3 = arith.constant 0 : index
    %c0_4 = arith.constant 0 : index
    %4 = vector.load %arg5[%c0_3, %c0_4] : memref<3x128xf32, #tpu.memory_space<vmem>>, vector<1x96xf32>
    %5 = vector.broadcast %4 : vector<1x96xf32> to vector<16x96xf32>
    %6 = arith.addf %3, %5 : vector<16x96xf32>
    %cst_5 = arith.constant 5.000000e-01 : f32
    %7 = vector.broadcast %cst_5 : f32 to vector<16x96xf32>
    %8 = arith.mulf %7, %6 : vector<16x96xf32>
    %cst_6 = arith.constant 4.471500e-02 : f32
    %9 = vector.broadcast %cst_6 : f32 to vector<16x96xf32>
    %10 = arith.mulf %9, %6 : vector<16x96xf32>
    %11 = arith.mulf %10, %6 : vector<16x96xf32>
    %12 = arith.mulf %11, %6 : vector<16x96xf32>
    %13 = arith.addf %6, %12 : vector<16x96xf32>
    %cst_7 = arith.constant 0.797884583 : f32
    %14 = vector.broadcast %cst_7 : f32 to vector<16x96xf32>
    %15 = arith.mulf %14, %13 : vector<16x96xf32>
    %16 = math.tanh %15 : vector<16x96xf32>
    %cst_8 = arith.constant 1.000000e+00 : f32
    %17 = vector.broadcast %cst_8 : f32 to vector<16x96xf32>
    %18 = arith.addf %17, %16 : vector<16x96xf32>
    %19 = arith.mulf %8, %18 : vector<16x96xf32>
    %20 = arith.truncf %19 : vector<16x96xf32> to vector<16x96xbf16>
    %c0_9 = arith.constant 0 : index
    %c0_10 = arith.constant 0 : index
    %21 = vector.load %arg3[%c0_9, %c0_10] : memref<96x96xbf16, #tpu.memory_space<vmem>>, vector<96x96xbf16>
    %cst_11 = arith.constant dense<0.000000e+00> : vector<16x96xf32>
    %22 = tpu.matmul %20, %21, %cst_11 {dimension_numbers = #tpu.dot_dimension_numbers<[1], [0], [0], [1], [0, 0, 1, 1], [], []>} : vector<16x96xbf16>, vector<96x96xbf16>, vector<16x96xf32> -> vector<16x96xf32>
    %c1 = arith.constant 1 : index
    %c0_12 = arith.constant 0 : index
    %23 = vector.load %arg5[%c1, %c0_12] : memref<3x128xf32, #tpu.memory_space<vmem>>, vector<1x96xf32>
    %24 = vector.broadcast %23 : vector<1x96xf32> to vector<16x96xf32>
    %25 = arith.addf %22, %24 : vector<16x96xf32>
    %cst_13 = arith.constant 5.000000e-01 : f32
    %26 = vector.broadcast %cst_13 : f32 to vector<16x96xf32>
    %27 = arith.mulf %26, %25 : vector<16x96xf32>
    %cst_14 = arith.constant 4.471500e-02 : f32
    %28 = vector.broadcast %cst_14 : f32 to vector<16x96xf32>
    %29 = arith.mulf %28, %25 : vector<16x96xf32>
    %30 = arith.mulf %29, %25 : vector<16x96xf32>
    %31 = arith.mulf %30, %25 : vector<16x96xf32>
    %32 = arith.addf %25, %31 : vector<16x96xf32>
    %cst_15 = arith.constant 0.797884583 : f32
    %33 = vector.broadcast %cst_15 : f32 to vector<16x96xf32>
    %34 = arith.mulf %33, %32 : vector<16x96xf32>
    %35 = math.tanh %34 : vector<16x96xf32>
    %cst_16 = arith.constant 1.000000e+00 : f32
    %36 = vector.broadcast %cst_16 : f32 to vector<16x96xf32>
    %37 = arith.addf %36, %35 : vector<16x96xf32>
    %38 = arith.mulf %27, %37 : vector<16x96xf32>
    %39 = arith.truncf %38 : vector<16x96xf32> to vector<16x96xbf16>
    %c0_17 = arith.constant 0 : index
    %c0_18 = arith.constant 0 : index
    %40 = vector.load %arg4[%c0_17, %c0_18] : memref<96x128xbf16, #tpu.memory_space<vmem>>, vector<96x128xbf16>
    %cst_19 = arith.constant dense<0.000000e+00> : vector<16x128xf32>
    %41 = tpu.matmul %39, %40, %cst_19 {dimension_numbers = #tpu.dot_dimension_numbers<[1], [0], [0], [1], [0, 0, 1, 1], [], []>} : vector<16x96xbf16>, vector<96x128xbf16>, vector<16x128xf32> -> vector<16x128xf32>
    %c2 = arith.constant 2 : index
    %c0_20 = arith.constant 0 : index
    %42 = vector.load %arg5[%c2, %c0_20] : memref<3x128xf32, #tpu.memory_space<vmem>>, vector<1x128xf32>
    %43 = vector.broadcast %42 : vector<1x128xf32> to vector<16x128xf32>
    %44 = arith.addf %41, %43 : vector<16x128xf32>
    %c0_21 = arith.constant 0 : index
    %c0_22 = arith.constant 0 : index
    %45 = vector.load %arg6[%c0_21, %c0_22] : memref<16x128xf32, #tpu.memory_space<vmem>>, vector<16x128xf32>
    tpu.vector_store %arg6[%c0_21, %c0_22], %44 {strides = array<i32>} : memref<16x128xf32, #tpu.memory_space<vmem>>, vector<16x128xf32>,
    return
  }
  func.func @transform_0(%arg0: i32) -> (i32, i32) {
    %c0_i32 = arith.constant 0 : i32
    %c0_i32_0 = arith.constant 0 : i32
    return %arg0, %c0_i32 : i32, i32
  }
  func.func @transform_1(%arg0: i32) -> (i32, i32) {
    %c0_i32 = arith.constant 0 : i32
    %c0_i32_0 = arith.constant 0 : i32
    %c0_i32_1 = arith.constant 0 : i32
    return %c0_i32, %c0_i32_0 : i32, i32
  }
  func.func @transform_2(%arg0: i32) -> (i32, i32) {
    %c0_i32 = arith.constant 0 : i32
    %c0_i32_0 = arith.constant 0 : i32
    %c0_i32_1 = arith.constant 0 : i32
    return %c0_i32, %c0_i32_0 : i32, i32
  }
  func.func @transform_3(%arg0: i32) -> (i32, i32) {
    %c0_i32 = arith.constant 0 : i32
    %c0_i32_0 = arith.constant 0 : i32
    %c0_i32_1 = arith.constant 0 : i32
    return %c0_i32, %c0_i32_0 : i32, i32
  }
  func.func @transform_4(%arg0: i32) -> (i32, i32) {
    %c0_i32 = arith.constant 0 : i32
    %c0_i32_0 = arith.constant 0 : i32
    %c0_i32_1 = arith.constant 0 : i32
    return %c0_i32, %c0_i32_0 : i32, i32
  }
  func.func @transform_5(%arg0: i32) -> (i32, i32) {
    %c0_i32 = arith.constant 0 : i32
    %c0_i32_0 = arith.constant 0 : i32
    return %arg0, %c0_i32 : i32, i32
  }
}

</mosaic_0001>

<bundles_post_ra>
// kernel: tpu_custom_call.1
= control target key start
LH: loop header
LB: loop body
LE: loop exit
PB: predicated region body
PF: predicated region fallthrough
CT: control target
= control target key end

     0   :  { %10 = vsyncpa [#allocation3], 0  ;;  %s796_s0 = inlined_call_operand.hbm [shape: f32[16,48], index: 0, kind: input, shape index: {}]   ;;  %s797_s1 = inlined_call_operand.hbm [shape: bf16[48,96], index: 1, kind: input, shape index: {}]   ;;  %s798_s2 = inlined_call_operand.hbm [shape: bf16[96,96], index: 2, kind: input, shape index: {}]   ;;  %s799_s3 = inlined_call_operand.hbm [shape: bf16[96,128], index: 3, kind: input, shape index: {}]   ;;  %s800_s4 = inlined_call_operand.vmem [shape: f32[3,128], index: 4, kind: input, shape index: {}]   ;;  %s801_s5 = inlined_call_operand.hbm [shape: f32[16,128], index: 5, kind: output, shape index: {}]  }
   0x1   :  { %11 = vsyncpa [#allocation6], 0 }
   0x2   :  { %12 = vsyncpa [#allocation9], 0 }
   0x3   :  { %13 = vsyncpa [#allocation4], 0  ;;  %s641_s18 = smov [#allocation5]   ;;  %s523_s22 = scalar_lea.hbm %s797_s1, 384 }
   0x4   :  { %s31_s19 = sshll.u32 %s641_s18, 4  ;;  %p524_p0 = scmp.ne.s32.totalorder %s797_s1, %s523_s22  ;;  %s32_s19 = int_to_ptr.vmem [resolvable:$true] %s31_s19 }
   0x5   :  { %p527_p1 = scmp.lt.u32.totalorder %s523_s22, %s797_s1 }
   0x7   :  { %p529_p2 = pnand %p527_p1, %p524_p0 }
   0x9   :  { %532 = shalt.err (!%p529_p2)
}
   0xa   :  { %s533_s27 = scalar_lea.vmem %s32_s19, 384  ;;  %p538_p4 = scmp.lt.s32.totalorder %s32_s19, %s32_s19 }
   0xb   :  { %p534_p3 = scmp.ne.s32.totalorder %s32_s19, %s533_s27  ;;  %p539_p5 = scmp.lt.s32.totalorder %s533_s27, %s533_s27 }
   0xd   :  { %p540_p6 = por %p539_p5, %p538_p4 }
   0xf   :  { %p541_p7 = pnand %p540_p6, %p534_p3 }
  0x11   :  { %544 = shalt.err (!%p541_p7)
}
  0x12   :  { %s642_s28 = smov 64   ;;  %s643_s29 = smov 4  }
  0x13   :  { %37 = dma.hbm_to_vmem [thread:$0]  %s797_s1, 384, %s32_s19, [#allocation6], %s642_s28, %s642_s28, %s643_s29  }
  0x14   :  { %s644_s7 = smov [#allocation2]   ;;  %s545_s11 = scalar_lea.hbm %s796_s0, 256 }
  0x15   :  { %s19_s8 = sshll.u32 %s644_s7, 4  ;;  %p546_p8 = scmp.ne.s32.totalorder %s796_s0, %s545_s11  ;;  %s20_s8 = int_to_ptr.vmem [resolvable:$true] %s19_s8 }
  0x16   :  { %p549_p9 = scmp.lt.u32.totalorder %s545_s11, %s796_s0 }
  0x18   :  { %p551_p10 = pnand %p549_p9, %p546_p8 }
  0x1a   :  { %554 = shalt.err (!%p551_p10)
}
  0x1b   :  { %s555_s16 = scalar_lea.vmem %s20_s8, 256  ;;  %p560_p12 = scmp.lt.s32.totalorder %s20_s8, %s20_s8 }
  0x1c   :  { %p556_p11 = scmp.ne.s32.totalorder %s20_s8, %s555_s16  ;;  %p561_p13 = scmp.lt.s32.totalorder %s555_s16, %s555_s16 }
  0x1e   :  { %p562_p0 = por %p561_p13, %p560_p12 }
  0x20   :  { %p563_p1 = pnand %p562_p0, %p556_p11 }
  0x22   :  { %566 = shalt.err (!%p563_p1)
}
  0x23   :  { %s645_s1 = smov 128   ;;  %s646_s17 = smov 8  }
  0x24   :  { %25 = dma.hbm_to_vmem [thread:$0]  %s796_s0, 256, %s20_s8, [#allocation3], %s645_s1, %s645_s1, %s646_s17  }
  0x25   :  { %s647_s20 = smov [#allocation7]   ;;  %s648_s22 = smov [#allocation8]  }
  0x26   :  { %s43_s21 = sshll.u32 %s647_s20, 4  ;;  %s55_s23 = sshll.u32 %s648_s22, 4  ;;  %s44_s21 = int_to_ptr.vmem [resolvable:$true] %s43_s21  ;;  %s712_s23 = int_to_ptr.vmem [resolvable:$true] %s55_s23 }
  0x27   :  { %s567_s26 = scalar_lea.hbm %s798_s2, 768 }
  0x28   :  { %p568_p2 = scmp.ne.s32.totalorder %s798_s2, %s567_s26  ;;  %p571_p3 = scmp.lt.u32.totalorder %s567_s26, %s798_s2 }
  0x2a   :  { %p573_p4 = pnand %p571_p3, %p568_p2 }
  0x2c   :  { %576 = shalt.err (!%p573_p4)
}
  0x2d   :  { %s577_s0 = scalar_lea.vmem %s44_s21, 768  ;;  %p582_p6 = scmp.lt.s32.totalorder %s44_s21, %s44_s21 }
  0x2e   :  { %p578_p5 = scmp.ne.s32.totalorder %s44_s21, %s577_s0  ;;  %p583_p7 = scmp.lt.s32.totalorder %s577_s0, %s577_s0 }
  0x30   :  { %p584_p8 = por %p583_p7, %p582_p6 }
  0x32   :  { %p585_p9 = pnand %p584_p8, %p578_p5 }
  0x34   :  { %588 = shalt.err (!%p585_p9)
}
  0x35   :  { %49 = dma.hbm_to_vmem [thread:$0]  %s798_s2, 768, %s44_s21, [#allocation6], %s642_s28, %s642_s28, %s643_s29  }
  0x36   :  { %s589_s12 = scalar_lea.hbm %s799_s3, 768 }
  0x37   :  { %p590_p10 = scmp.ne.s32.totalorder %s799_s3, %s589_s12  ;;  %p593_p11 = scmp.lt.u32.totalorder %s589_s12, %s799_s3 }
  0x39   :  { %p595_p12 = pnand %p593_p11, %p590_p10 }
  0x3b   :  { %598 = shalt.err (!%p595_p12)
}
  0x3c   :  { %s599_s18 = scalar_lea.vmem %s712_s23, 768  ;;  %p604_p0 = scmp.lt.s32.totalorder %s712_s23, %s712_s23 }
  0x3d   :  { %p600_p13 = scmp.ne.s32.totalorder %s712_s23, %s599_s18  ;;  %p605_p1 = scmp.lt.s32.totalorder %s599_s18, %s599_s18 }
  0x3f   :  { %p606_p2 = por %p605_p1, %p604_p0 }
  0x41   :  { %p607_p3 = pnand %p606_p2, %p600_p13 }
  0x43   :  { %610 = shalt.err (!%p607_p3)
}
  0x44   :  { %61 = dma.hbm_to_vmem [thread:$0]  %s799_s3, 768, %s712_s23, [#allocation9], %s642_s28, %s642_s28, %s643_s29  }
  0x45   :  { %633 = dma.done.wait [#allocation3], 256  }
  0x46   :  { %634 = vsyncadd [#allocation3], 4294967040 }
  0x47   :  { %635 = dma.done.wait [#allocation6], 1152  }
  0x48   :  { %636 = vsyncadd [#allocation6], 4294966144 }
  0x49   :  { %637 = dma.done.wait [#allocation9], 768  }
  0x4a   :  { %638 = vsyncadd [#allocation9], 4294966528  ;;  %v649_v0 = vmov 0.0   ;;  %vm650_vm0 = vmmov 0   ;;  %v500_v1 = vld [vmem:[#allocation5] sm:$0xff]   ;;  %v501_v2 = vld [vmem:[#allocation5 + $0x8] sm:$0xff]  }
  0x4b   :  { %447 = vmatprep.subr.bf16.mxu0 %v649_v0  ;;  %453 = vmatprep.mubr.msk.bf16.mxu0 %vm650_vm0, %v649_v0  ;;  %vm109_vm1 = vcmask 392192   ;;  %v502_v3 = vld [vmem:[#allocation5 + $0x10] sm:$0xff]   ;;  %v78_v5 = vld [vmem:[#allocation2 + $0x8] sm:$0xff]  ;;  %v504_v8 = vld [vmem:[#allocation7 + $0x8] sm:$0xff]   ;;  %vm226_vm2 = vcmask 785408   ;;  %s651_s23 = smov [#allocation10]  }
  0x4c   :  { %457 = vmatprep.subr.bf16.mxu1 %v649_v0  ;;  %469 = vmatprep.mubr.msk.bf16.mxu1 %vm650_vm0, %v649_v0  ;;  %v77_v4 = vld [vmem:[#allocation2] sm:$0xff]  ;;  %v503_v7 = vld [vmem:[#allocation7] sm:$0xff]   ;;  %v505_v9 = vld [vmem:[#allocation7 + $0x10] sm:$0xff]   ;;  %s394_s24 = sshll.u32 %s651_s23, 4  ;;  %s395_s24 = int_to_ptr.vmem [resolvable:$true] %s394_s24 }
  0x4d   :  { %448 = vmatpush3.bf16.msra.mxu0 %v500_v1  ;;  %v79_v6 = vpack.c.bf16 %v78_v5, %v77_v4  ;;  %458 = vmatpush3.bf16.msra.mxu1 %v503_v7  ;;  %v506_v10 = vld [vmem:[#allocation7 + $0x18] sm:$0xff]   ;;  %v507_v11 = vld [vmem:[#allocation7 + $0x20] sm:$0xff]   ;;  %v508_v12 = vld [vmem:[#allocation7 + $0x28] sm:$0xff]   ;;  %s611_s25 = scalar_lea.vmem %s395_s24, 256  ;;  %p616_p5 = scmp.lt.s32.totalorder %s395_s24, %s395_s24 }
  0x4e   :  { %449 = vmatprep.subr.bf16.mxu0 %v649_v0  ;;  %459 = vmatprep.subr.bf16.mxu1 %v649_v0  ;;  %v408_v13 = vld [vmem:[%s800_s4] ss:$0 sm:$0xff]  ;;  %v509_v39 = vld [vmem:[#allocation8] sm:$0xff]   ;;  %v511_v41 = vld [vmem:[#allocation8 + $0x10] sm:$0xff]   ;;  %p612_p4 = scmp.ne.s32.totalorder %s395_s24, %s611_s25  ;;  %p617_p6 = scmp.lt.s32.totalorder %s611_s25, %s611_s25 }
  0x4f   :  { %v510_v40 = vld [vmem:[#allocation8 + $0x8] sm:$0xff]   ;;  %v512_v42 = vld [vmem:[#allocation8 + $0x18] sm:$0xff]   ;;  %v513_v43 = vld [vmem:[#allocation8 + $0x20] sm:$0xff]  }
  0x50   :  { %v514_v44 = vld [vmem:[#allocation8 + $0x28] sm:$0xff]   ;;  %p618_p7 = por %p617_p6, %p616_p5 }
  0x51   :  { %450 = vmatpush3.bf16.msra.mxu0 %v501_v2  ;;  %460 = vmatpush3.bf16.msra.mxu1 %v504_v8  ;;  %v413_v45 = vld [vmem:[%s800_s4 + $0x1] ss:$0 sm:$0xff]  ;;  %v421_v7 = vld [vmem:[%s800_s4 + $0x2] ss:$0 sm:$0xff] }
  0x52   :  { %451 = vmatprep.subr.bf16.mxu0 %v649_v0  ;;  %461 = vmatprep.subr.bf16.mxu1 %v649_v0  ;;  %p619_p8 = pnand %p618_p7, %p612_p4 }
  0x55   :  { %452 = vmatpush3.bf16.msra.mxu0 %v502_v3  ;;  %462 = vmatpush3.bf16.msra.mxu1 %v505_v9 }
  0x56   :  { %473 = vmatprep.subr.bf16.mxu0 %v649_v0  ;;  %463 = vmatprep.subr.bf16.mxu1 %v649_v0 }
  0x58   :  { %454 = vmatmul.mubr.msk.bf16.vlgmr.msra.gmra.mrb[0].mxu0 %vm109_vm1, %v79_v6 }
  0x59   :  { %485 = vmatprep.mubr.msk.bf16.mxu0 %vm650_vm0, %v649_v0  ;;  %464 = vmatpush3.bf16.msra.mxu1 %v506_v10 }
  0x5a   :  { %465 = vmatprep.subr.bf16.mxu1 %v649_v0  ;;  %474 = vmatpush3.bf16.msra.mxu0 %v509_v39 }
  0x5b   :  { %475 = vmatprep.subr.bf16.mxu0 %v649_v0 }
  0x5d   :  { %466 = vmatpush3.bf16.msra.mxu1 %v507_v11 }
  0x5e   :  { %467 = vmatprep.subr.bf16.mxu1 %v649_v0  ;;  %476 = vmatpush3.bf16.msra.mxu0 %v510_v40 }
  0x5f   :  { %477 = vmatprep.subr.bf16.mxu0 %v649_v0 }
  0x61   :  { %468 = vmatpush3.bf16.msra.mxu1 %v508_v12 }
  0x62   :  { %478 = vmatpush3.bf16.msra.mxu0 %v511_v41 }
  0x63   :  { %479 = vmatprep.subr.bf16.mxu0 %v649_v0 }
  0x66   :  { %480 = vmatpush3.bf16.msra.mxu0 %v512_v42 }
  0x67   :  { %481 = vmatprep.subr.bf16.mxu0 %v649_v0 }
  0x6a   :  { %482 = vmatpush3.bf16.msra.mxu0 %v513_v43 }
  0x6b   :  { %483 = vmatprep.subr.bf16.mxu0 %v649_v0 }
  0x6e   :  { %484 = vmatpush3.bf16.msra.mxu0 %v514_v44 }
 0x12b   :  { %v147_v14 = vpop.f32.mrb[0].mxu0 }
 0x12c   :  { %v148_v15 = vadd.f32 %v408_v13, %v147_v14  ;;  %v455_v16 = vpop.f32.mrb[1].mxu0 }
 0x12d   :  { %v150_v17 = vpop.f32.mrb[2].mxu0 }
 0x12e   :  { %v156_v18 = vmul.f32 0.044715, %v148_v15  ;;  %v151_v19 = vadd.f32 %v408_v13, %v150_v17  ;;  %v456_v20 = vpop.f32.mrb[3].mxu0  ;;  %v154_v33 = vmul.f32 0.5, %v148_v15 }
 0x130   :  { %v158_v21 = vmul.f32 %v156_v18, %v148_v15  ;;  %v157_v22 = vmul.f32 0.044715, %v151_v19  ;;  %v155_v34 = vmul.f32 0.5, %v151_v19 }
 0x132   :  { %v160_v23 = vmul.f32 %v158_v21, %v148_v15  ;;  %v159_v24 = vmul.f32 %v157_v22, %v151_v19 }
 0x134   :  { %v162_v25 = vadd.f32 %v160_v23, %v148_v15  ;;  %v161_v26 = vmul.f32 %v159_v24, %v151_v19 }
 0x136   :  { %v164_v27 = vmul.f32 0.7978846, %v162_v25  ;;  %v163_v28 = vadd.f32 %v161_v26, %v151_v19 }
 0x138   :  { %515 = vtanh.f32 %v164_v27  ;;  %v165_v29 = vmul.f32 0.7978846, %v163_v28 }
 0x13a   :  { %517 = vtanh.f32 %v165_v29 }
 0x142   :  { %v516_v30 = vpop.eup %515 }
 0x143   :  { %v168_v31 = vadd.f32 1.0, %v516_v30 }
 0x144   :  { %v518_v32 = vpop.eup %517 }
 0x145   :  { %v169_v35 = vadd.f32 1.0, %v518_v32  ;;  %v170_v36 = vmul.f32 %v168_v31, %v154_v33 }
 0x147   :  { %v171_v37 = vmul.f32 %v169_v35, %v155_v34 }
 0x149   :  { %v172_v38 = vpack.c.bf16 %v171_v37, %v170_v36 }
 0x14b   :  { %470 = vmatmul.mubr.msk.bf16.vlgmr.msra.gmra.mrb[0].mxu1 %vm226_vm2, %v172_v38 }
 0x21e   :  { %v264_v46 = vpop.f32.mrb[0].mxu1 }
 0x21f   :  { %v265_v47 = vadd.f32 %v413_v45, %v264_v46  ;;  %v471_v48 = vpop.f32.mrb[1].mxu1 }
 0x220   :  { %v267_v49 = vpop.f32.mrb[2].mxu1 }
 0x221   :  { %v273_v50 = vmul.f32 0.044715, %v265_v47  ;;  %v268_v51 = vadd.f32 %v413_v45, %v267_v49  ;;  %v472_v52 = vpop.f32.mrb[3].mxu1  ;;  %v271_v1 = vmul.f32 0.5, %v265_v47 }
 0x223   :  { %v275_v53 = vmul.f32 %v273_v50, %v265_v47  ;;  %v274_v54 = vmul.f32 0.044715, %v268_v51  ;;  %v272_v2 = vmul.f32 0.5, %v268_v51 }
 0x225   :  { %v277_v55 = vmul.f32 %v275_v53, %v265_v47  ;;  %v276_v56 = vmul.f32 %v274_v54, %v268_v51 }
 0x227   :  { %v279_v57 = vadd.f32 %v277_v55, %v265_v47  ;;  %v278_v58 = vmul.f32 %v276_v56, %v268_v51 }
 0x229   :  { %v281_v59 = vmul.f32 0.7978846, %v279_v57  ;;  %v280_v60 = vadd.f32 %v278_v58, %v268_v51 }
 0x22b   :  { %519 = vtanh.f32 %v281_v59  ;;  %v282_v61 = vmul.f32 0.7978846, %v280_v60 }
 0x22d   :  { %521 = vtanh.f32 %v282_v61 }
 0x235   :  { %v520_v62 = vpop.eup %519 }
 0x236   :  { %v285_v63 = vadd.f32 1.0, %v520_v62 }
 0x237   :  { %v522_v0 = vpop.eup %521 }
 0x238   :  { %v286_v3 = vadd.f32 1.0, %v522_v0  ;;  %v287_v4 = vmul.f32 %v285_v63, %v271_v1 }
 0x23a   :  { %v288_v5 = vmul.f32 %v286_v3, %v272_v2 }
 0x23c   :  { %v289_v6 = vpack.c.bf16 %v288_v5, %v287_v4 }
 0x23e   :  { %486 = vmatmul.mubr.msk.bf16.vlgmr.msra.gmra.mrb[4].mxu0 %vm226_vm2, %v289_v6 }
 0x311   :  { %v380_v8 = vpop.f32.mrb[4].mxu0 }
 0x312   :  { %v381_v9 = vadd.f32 %v421_v7, %v380_v8  ;;  %v487_v10 = vpop.f32.mrb[5].mxu0 }
 0x313   :  { %v383_v11 = vpop.f32.mrb[6].mxu0 }
 0x314   :  { %387 = vst [vmem:[#allocation10] sm:$0xff] %v381_v9  ;;  %v384_v12 = vadd.f32 %v421_v7, %v383_v11  ;;  %v488_v13 = vpop.f32.mrb[7].mxu0 }
 0x316   :  { %388 = vst [vmem:[#allocation10 + $0x8] sm:$0xff] %v384_v12 }
 0x317   :  { %622 = shalt.err (!%p619_p8)
}
 0x318   :  { %s623_s27 = scalar_lea.hbm %s801_s5, 256 }
 0x319   :  { %p624_p9 = scmp.ne.s32.totalorder %s801_s5, %s623_s27  ;;  %p627_p10 = scmp.lt.u32.totalorder %s623_s27, %s801_s5 }
 0x31b   :  { %p629_p11 = pnand %p627_p10, %p624_p9 }
 0x31d   :  { %632 = shalt.err (!%p629_p11)
}
 0x31e   :  { %400 = dma.vmem_to_hbm [thread:$0]  %s395_s24, 256, %s801_s5, [#allocation4], %s645_s1, %s645_s1, %s646_s17  }
 0x31f   :  { %639 = dma.done.wait [#allocation4], 256  }
 0x320   :  { %640 = vsyncadd [#allocation4], 4294967040 }
 0x321   :  { %404 = vsyncpa [#allocation3], 1 }
 0x322   :  { %405 = vsyncpa [#allocation6], 1 }
 0x323   :  { %406 = vsyncpa [#allocation9], 1 }
 0x324   :  { %407 = vsyncpa [#allocation4], 1 }

</bundles_post_ra>
